<compile_context>
chip_gen: v7x
topology: tpu7x:2x2x1
jax: 0.10.0
libtpu: 0.0.40
codegen_flags: <defaults>
</compile_context>

<pallas_src>
import functools

import jax
import jax.numpy as jnp
from jax import lax
from jax.experimental import pallas as pl
from jax.experimental.pallas import tpu as pltpu

_LANE = 128
_SUBLANE = 8
_MAX_BLOCK_ROWS = 8192   # 8192 * 128 * 4 B = 4 MiB per f32 input block per step
_NUM_PARALLEL = 2        # v7x has 2 TensorCores; harmless on v5e/v6e (1 TC)


def _tanh_sse_kernel(x_ref, t_ref, out_ref, acc_ref, *,
                     steps_per_chunk, total_steps, rows, block_rows,
                     k_split, ragged):
    """Per parallel chunk: accumulate sum((tanh(x) - t)^2) over its blocks."""
    i = pl.program_id(0)                 # parallel chunk index
    k = pl.program_id(1)                 # reduction step within the chunk
    g = i * steps_per_chunk + k          # global block index

    @pl.when(k == 0)
    def _():
        acc_ref[...] = jnp.zeros_like(acc_ref)

    def block_sq():
        x = x_ref[...].astype(jnp.float32)
        t = t_ref[...].astype(jnp.float32)
        d = jnp.tanh(x) - t
        return d * d

    def fold(sq):
        # (block_rows, 128) -> (block_rows/(K*8), K*8, 128) sum over axis 0:
        # K*8 sublanes of independent partials -> one vreg-wide add chain per
        # K*8-row group instead of a single serial (8,128) chain.
        acc_ref[...] += jnp.sum(
            sq.reshape(-1, k_split * _SUBLANE, _LANE), axis=0)

    n_full = total_steps - 1 if ragged else total_steps

    # Full (unmasked) blocks: no iota/compare/select in the hot path.
    @pl.when(g < n_full)
    def _():
        fold(block_sq())

    if ragged:
        # Only the single globally-last block carries the row mask.
        @pl.when(g == total_steps - 1)
        def _():
            sq = block_sq()
            row_ids = (lax.broadcasted_iota(jnp.int32, sq.shape, 0)
                       + g * block_rows)
            fold(jnp.where(row_ids < rows, sq, jnp.float32(0.0)))

    @pl.when(k == steps_per_chunk - 1)
    def _():
        # Collapse the K independent accumulators once per chunk; the output
        # block is a full, lane-dense (8, 128) tile (unmasked stores).
        out_ref[...] = jnp.sum(
            acc_ref[...].reshape(k_split, _SUBLANE, _LANE), axis=0)


def hv_branch_loss(hv_logits: jax.Array, hv_targets: jax.Array,
                   *, max_block_rows: int = _MAX_BLOCK_ROWS) -> jax.Array:
    """JAX/Pallas equivalent of _HVBranchLoss.forward (returns La)."""
    assert hv_logits.shape == hv_targets.shape
    n_elems = 1
    for s in hv_logits.shape:
        n_elems *= int(s)

    x_flat = hv_logits.reshape(-1)
    t_flat = hv_targets.reshape(-1)

    # Sublane-packing granularity: 16-bit dtypes pack 2 rows per sublane,
    # 8-bit pack 4 -> keep rows a multiple of 8 * pack.
    itemsize = min(hv_logits.dtype.itemsize, hv_targets.dtype.itemsize)
    pack = max(1, 4 // max(1, itemsize))
    row_align = _SUBLANE * pack
    align_elems = row_align * _LANE

    n_main = (n_elems // align_elems) * align_elems
    sse = jnp.float32(0.0)

    if n_main:
        # Aligned prefix through the Pallas kernel (no padding copy; when the
        # size already divides this is just a reshape of the full array).
        x_main = x_flat if n_main == n_elems else x_flat[:n_main]
        t_main = t_flat if n_main == n_elems else t_flat[:n_main]
        rows = n_main // _LANE                       # multiple of row_align
        x2 = x_main.reshape(rows, _LANE)
        t2 = t_main.reshape(rows, _LANE)

        block_rows = min(
            rows, max(row_align, (max_block_rows // row_align) * row_align))
        total_steps = pl.cdiv(rows, block_rows)
        ragged = (rows % block_rows) != 0
        n_par = min(_NUM_PARALLEL, total_steps)
        steps_per_chunk = pl.cdiv(total_steps, n_par)

        # Largest accumulator split that divides the block (chain / ILP win).
        k_split = 1
        for cand in (8, 4, 2):
            if block_rows % (cand * _SUBLANE) == 0:
                k_split = cand
                break

        kernel = functools.partial(
            _tanh_sse_kernel,
            steps_per_chunk=steps_per_chunk,   # static Python ints/bools only
            total_steps=total_steps,
            rows=rows,
            block_rows=block_rows,
            k_split=k_split,
            ragged=ragged,
        )

        def in_map(i, k):
            # Clamp padded (out-of-range) steps of the last chunk to a valid
            # block; the kernel skips accumulation for them via pl.when.
            return (jnp.minimum(i * steps_per_chunk + k, total_steps - 1), 0)

        partials = pl.pallas_call(
            kernel,
            out_shape=jax.ShapeDtypeStruct((n_par * _SUBLANE, _LANE),
                                           jnp.float32),
            grid_spec=pltpu.PrefetchScalarGridSpec(
                num_scalar_prefetch=0,
                grid=(n_par, steps_per_chunk),
                in_specs=[
                    pl.BlockSpec((block_rows, _LANE), in_map),
                    pl.BlockSpec((block_rows, _LANE), in_map),
                ],
                out_specs=pl.BlockSpec((_SUBLANE, _LANE),
                                       lambda i, k: (i, 0)),
                scratch_shapes=[
                    pltpu.VMEM((k_split * _SUBLANE, _LANE), jnp.float32)],
            ),
            compiler_params=pltpu.CompilerParams(
                dimension_semantics=("parallel", "arbitrary"),
                vmem_limit_bytes=32 * 1024 * 1024,
            ),
        )(x2, t2)
        sse = sse + jnp.sum(partials)

    if n_main < n_elems:
        # Tiny unaligned tail (< row_align*128 elements): plain XLA.
        x_tail = x_flat[n_main:].astype(jnp.float32)
        t_tail = t_flat[n_main:].astype(jnp.float32)
        d = jnp.tanh(x_tail) - t_tail
        sse = sse + jnp.sum(d * d)

    # Mean over the ORIGINAL element count (torch MSELoss reduction='mean').
    return sse / jnp.float32(n_elems)


def _reference_hv_branch_loss(hv_logits, hv_targets):
    p = jnp.tanh(hv_logits.astype(jnp.float32))
    return jnp.mean((p - hv_targets.astype(jnp.float32)) ** 2)


def _check(shape, key, **kwargs):
    k1, k2 = jax.random.split(key)
    x = jax.random.normal(k1, shape, dtype=jnp.float32)
    t = jax.random.uniform(k2, shape, minval=-1.0, maxval=1.0,
                           dtype=jnp.float32)
    out = jax.block_until_ready(hv_branch_loss(x, t, **kwargs))
    ref = _reference_hv_branch_loss(x, t)
    assert jnp.allclose(out, ref, atol=1e-5, rtol=1e-4), (shape, out, ref)
    return out


if __name__ == "__main__":
    key = jax.random.PRNGKey(0)
    k0, k1, k2 = jax.random.split(key, 3)

    # HV branch: (N, 2, H, W), channel 0 = horizontal, channel 1 = vertical.
    _check((2, 2, 16, 16), k0)

    # Small extra validations that force the multi-step / parallel / ragged /
    # tail code paths (tiny max_block_rows override, odd spatial sizes).
    _check((2, 2, 32, 64), k1, max_block_rows=16)   # 2 chunks x 2 full blocks
    _check((2, 2, 28, 33), k2, max_block_rows=16)   # ragged last block + tail

    print("KERNEL_OK")
</pallas_src>

<mosaic_0001>
module attributes {stable_mosaic.version = 11 : i64} {
  func.func @_tanh_sse_kernel(%arg0: i32, %arg1: i32, %arg2: memref<8x128xf32, #tpu.memory_space<vmem>>, %arg3: memref<8x128xf32, #tpu.memory_space<vmem>>, %arg4: memref<8x128xf32, #tpu.memory_space<vmem>>, %arg5: memref<8x128xf32, #tpu.memory_space<vmem>>) attributes {dimension_semantics = [#tpu.dimension_semantics<parallel>, #tpu.dimension_semantics<arbitrary>], iteration_bounds = array<i64: 1, 1>, scalar_prefetch = 0 : i64, scratch_operands = 1 : i64, tpu.core_type = #tpu.core_type<tc>, window_params = [{transform_indices = @transform_0, window_bounds = array<i64: 8, 128>}, {transform_indices = @transform_1, window_bounds = array<i64: 8, 128>}, {transform_indices = @transform_2, window_bounds = array<i64: 8, 128>}]} {
    %c1_i32 = arith.constant 1 : i32
    %0 = arith.muli %arg0, %c1_i32 : i32
    %1 = arith.addi %0, %arg1 : i32
    %c0_i32 = arith.constant 0 : i32
    %2 = arith.cmpi eq, %arg1, %c0_i32 : i32
    %3 = arith.extui %2 : i1 to i32
    %c0_i32_0 = arith.constant 0 : i32
    %4 = arith.cmpi ne, %3, %c0_i32_0 : i32
    scf.if %4 {
      %cst = arith.constant 0.000000e+00 : f32
      %11 = vector.broadcast %cst : f32 to vector<8x128xf32>
      %c0 = arith.constant 0 : index
      %c0_5 = arith.constant 0 : index
      %12 = vector.load %arg5[%c0, %c0_5] : memref<8x128xf32, #tpu.memory_space<vmem>>, vector<8x128xf32>
      tpu.vector_store %arg5[%c0, %c0_5], %11 {strides = array<i32>} : memref<8x128xf32, #tpu.memory_space<vmem>>, vector<8x128xf32>,
    } else {
    }
    %c1_i32_1 = arith.constant 1 : i32
    %5 = arith.cmpi slt, %1, %c1_i32_1 : i32
    %6 = arith.extui %5 : i1 to i32
    %c0_i32_2 = arith.constant 0 : i32
    %7 = arith.cmpi ne, %6, %c0_i32_2 : i32
    scf.if %7 {
      %c0 = arith.constant 0 : index
      %c0_5 = arith.constant 0 : index
      %11 = vector.load %arg2[%c0, %c0_5] : memref<8x128xf32, #tpu.memory_space<vmem>>, vector<8x128xf32>
      %c0_6 = arith.constant 0 : index
      %c0_7 = arith.constant 0 : index
      %12 = vector.load %arg3[%c0_6, %c0_7] : memref<8x128xf32, #tpu.memory_space<vmem>>, vector<8x128xf32>
      %13 = math.tanh %11 : vector<8x128xf32>
      %14 = arith.subf %13, %12 : vector<8x128xf32>
      %15 = arith.mulf %14, %14 : vector<8x128xf32>
      %c0_8 = arith.constant 0 : index
      %c0_9 = arith.constant 0 : index
      %16 = vector.load %arg5[%c0_8, %c0_9] : memref<8x128xf32, #tpu.memory_space<vmem>>, vector<8x128xf32>
      %17 = vector.shape_cast %15 : vector<8x128xf32> to vector<1x8x128xf32>
      %cst = arith.constant dense<0.000000e+00> : vector<8x128xf32>
      %18 = vector.multi_reduction <add>, %17, %cst [0] : vector<1x8x128xf32> to vector<8x128xf32>
      %19 = arith.addf %16, %18 : vector<8x128xf32>
      %c0_10 = arith.constant 0 : index
      %c0_11 = arith.constant 0 : index
      %20 = vector.load %arg5[%c0_10, %c0_11] : memref<8x128xf32, #tpu.memory_space<vmem>>, vector<8x128xf32>
      tpu.vector_store %arg5[%c0_10, %c0_11], %19 {strides = array<i32>} : memref<8x128xf32, #tpu.memory_space<vmem>>, vector<8x128xf32>,
    } else {
    }
    %c0_i32_3 = arith.constant 0 : i32
    %8 = arith.cmpi eq, %arg1, %c0_i32_3 : i32
    %9 = arith.extui %8 : i1 to i32
    %c0_i32_4 = arith.constant 0 : i32
    %10 = arith.cmpi ne, %9, %c0_i32_4 : i32
    scf.if %10 {
      %c0 = arith.constant 0 : index
      %c0_5 = arith.constant 0 : index
      %11 = vector.load %arg5[%c0, %c0_5] : memref<8x128xf32, #tpu.memory_space<vmem>>, vector<8x128xf32>
      %12 = vector.shape_cast %11 : vector<8x128xf32> to vector<1x8x128xf32>
      %cst = arith.constant dense<0.000000e+00> : vector<8x128xf32>
      %13 = vector.multi_reduction <add>, %12, %cst [0] : vector<1x8x128xf32> to vector<8x128xf32>
      %c0_6 = arith.constant 0 : index
      %c0_7 = arith.constant 0 : index
      %14 = vector.load %arg4[%c0_6, %c0_7] : memref<8x128xf32, #tpu.memory_space<vmem>>, vector<8x128xf32>
      tpu.vector_store %arg4[%c0_6, %c0_7], %13 {strides = array<i32>} : memref<8x128xf32, #tpu.memory_space<vmem>>, vector<8x128xf32>,
    } else {
    }
    return
  }
  func.func @transform_0(%arg0: i32, %arg1: i32) -> (i32, i32) {
    %c1_i32 = arith.constant 1 : i32
    %0 = arith.muli %arg0, %c1_i32 : i32
    %1 = arith.addi %0, %arg1 : i32
    %c0_i32 = arith.constant 0 : i32
    %2 = arith.minsi %1, %c0_i32 : i32
    %c0_i32_0 = arith.constant 0 : i32
    %c0_i32_1 = arith.constant 0 : i32
    return %2, %c0_i32_0 : i32, i32
  }
  func.func @transform_1(%arg0: i32, %arg1: i32) -> (i32, i32) {
    %c1_i32 = arith.constant 1 : i32
    %0 = arith.muli %arg0, %c1_i32 : i32
    %1 = arith.addi %0, %arg1 : i32
    %c0_i32 = arith.constant 0 : i32
    %2 = arith.minsi %1, %c0_i32 : i32
    %c0_i32_0 = arith.constant 0 : i32
    %c0_i32_1 = arith.constant 0 : i32
    return %2, %c0_i32_0 : i32, i32
  }
  func.func @transform_2(%arg0: i32, %arg1: i32) -> (i32, i32) {
    %c0_i32 = arith.constant 0 : i32
    %c0_i32_0 = arith.constant 0 : i32
    return %arg0, %c0_i32 : i32, i32
  }
}

</mosaic_0001>

<bundles_post_ra>
// kernel: tpu_custom_call.1
= control target key start
LH: loop header
LB: loop body
LE: loop exit
PB: predicated region body
PF: predicated region fallthrough
CT: control target
= control target key end

     0   :  { %7 = vsyncpa [#allocation4], 0  ;;  %s228_s0 = inlined_call_operand.hbm [shape: f32[8,128], index: 0, kind: input, shape index: {}]   ;;  %s229_s1 = inlined_call_operand.hbm [shape: f32[8,128], index: 1, kind: input, shape index: {}]   ;;  %s230_s2 = inlined_call_operand.hbm [shape: f32[8,128], index: 2, kind: output, shape index: {}]  }
   0x1   :  { %8 = vsyncpa [#allocation7], 0 }
   0x2   :  { %9 = vsyncpa [#allocation5], 0  ;;  %s174_s9 = smov [#allocation3]   ;;  %s175_s11 = smov [#allocation6]  }
   0x3   :  { %s21_s10 = sshll.u32 %s174_s9, 4  ;;  %s36_s12 = sshll.u32 %s175_s11, 4  ;;  %s22_s10 = int_to_ptr.vmem [resolvable:$true] %s21_s10  ;;  %s37_s12 = int_to_ptr.vmem [resolvable:$true] %s36_s12 }
   0x4   :  { %s102_s15 = scalar_lea.hbm %s228_s0, 128 }
   0x5   :  { %p103_p0 = scmp.ne.s32.totalorder %s228_s0, %s102_s15  ;;  %p106_p1 = scmp.lt.u32.totalorder %s102_s15, %s228_s0 }
   0x7   :  { %p108_p2 = pnand %p106_p1, %p103_p0 }
   0x9   :  { %111 = shalt.err (!%p108_p2)
}
   0xa   :  { %s112_s20 = scalar_lea.vmem %s22_s10, 128  ;;  %p117_p4 = scmp.lt.s32.totalorder %s22_s10, %s22_s10 }
   0xb   :  { %p113_p3 = scmp.ne.s32.totalorder %s22_s10, %s112_s20  ;;  %p118_p5 = scmp.lt.s32.totalorder %s112_s20, %s112_s20 }
   0xd   :  { %p119_p6 = por %p118_p5, %p117_p4 }
   0xf   :  { %p120_p7 = pnand %p119_p6, %p113_p3 }
  0x11   :  { %123 = shalt.err (!%p120_p7)
}
  0x12   :  { %24 = dma.hbm_to_vmem [thread:$0]  %s228_s0, 128, %s22_s10, [#allocation4]  }
  0x13   :  { %s124_s25 = scalar_lea.hbm %s229_s1, 128 }
  0x14   :  { %p125_p8 = scmp.ne.s32.totalorder %s229_s1, %s124_s25  ;;  %p128_p9 = scmp.lt.u32.totalorder %s124_s25, %s229_s1 }
  0x16   :  { %p130_p10 = pnand %p128_p9, %p125_p8 }
  0x18   :  { %133 = shalt.err (!%p130_p10)
}
  0x19   :  { %s134_s30 = scalar_lea.vmem %s37_s12, 128  ;;  %p139_p12 = scmp.lt.s32.totalorder %s37_s12, %s37_s12 }
  0x1a   :  { %p135_p11 = scmp.ne.s32.totalorder %s37_s12, %s134_s30  ;;  %p140_p13 = scmp.lt.s32.totalorder %s134_s30, %s134_s30 }
  0x1c   :  { %p141_p0 = por %p140_p13, %p139_p12 }
  0x1e   :  { %p142_p1 = pnand %p141_p0, %p135_p11 }
  0x20   :  { %145 = shalt.err (!%p142_p1)
}
  0x21   :  { %39 = dma.hbm_to_vmem [thread:$0]  %s229_s1, 128, %s37_s12, [#allocation7]  }
  0x22   :  { %168 = dma.done.wait [#allocation4], 128  }
  0x23   :  { %169 = vsyncadd [#allocation4], 4294967168 }
  0x24   :  { %170 = dma.done.wait [#allocation7], 128  }
  0x25   :  { %171 = vsyncadd [#allocation7], 4294967168  ;;  %v62_v0 = vld [vmem:[#allocation3] sm:$0xff]  ;;  %v63_v1 = vld [vmem:[#allocation6] sm:$0xff]  ;;  %s176_s4 = smov [#allocation8]  }
  0x26   :  { %100 = vtanh.f32 %v62_v0  ;;  %s83_s5 = sshll.u32 %s176_s4, 4  ;;  %s84_s5 = int_to_ptr.vmem [resolvable:$true] %s83_s5 }
  0x27   :  { %s146_s6 = scalar_lea.vmem %s84_s5, 128  ;;  %p151_p3 = scmp.lt.s32.totalorder %s84_s5, %s84_s5 }
  0x28   :  { %p147_p2 = scmp.ne.s32.totalorder %s84_s5, %s146_s6  ;;  %p152_p4 = scmp.lt.s32.totalorder %s146_s6, %s146_s6 }
  0x2a   :  { %p153_p5 = por %p152_p4, %p151_p3 }
  0x2c   :  { %p154_p6 = pnand %p153_p5, %p147_p2 }
  0x30   :  { %v101_v2 = vpop.eup %100 }
  0x31   :  { %v65_v3 = vsub.f32 %v101_v2, %v63_v1 }
  0x33   :  { %v66_v4 = vmul.f32 %v65_v3, %v65_v3 }
  0x35   :  { %76 = vst [vmem:[#allocation8] sm:$0xff] %v66_v4 }
  0x36   :  { %157 = shalt.err (!%p154_p6)
}
  0x37   :  { %s158_s8 = scalar_lea.hbm %s230_s2, 128 }
  0x38   :  { %p159_p7 = scmp.ne.s32.totalorder %s230_s2, %s158_s8  ;;  %p162_p8 = scmp.lt.u32.totalorder %s158_s8, %s230_s2 }
  0x3a   :  { %p164_p9 = pnand %p162_p8, %p159_p7 }
  0x3c   :  { %167 = shalt.err (!%p164_p9)
}
  0x3d   :  { %86 = dma.vmem_to_hbm [thread:$0]  %s84_s5, 128, %s230_s2, [#allocation5]  }
  0x3e   :  { %172 = dma.done.wait [#allocation5], 128  }
  0x3f   :  { %173 = vsyncadd [#allocation5], 4294967168 }
  0x40   :  { %90 = vsyncpa [#allocation4], 1 }
  0x41   :  { %91 = vsyncpa [#allocation7], 1 }
  0x42   :  { %92 = vsyncpa [#allocation5], 1 }

</bundles_post_ra>
